<compile_context>
chip_gen: v7x
topology: tpu7x:2x2x1
jax: 0.10.0
libtpu: 0.0.40
codegen_flags: <defaults>
</compile_context>

<pallas_src>
import functools

import jax
import jax.numpy as jnp
from jax import lax
from jax.experimental import pallas as pl
from jax.experimental.pallas import tpu as pltpu

_MAX_BLOCK_F32_BYTES = 1 << 20  # 1 MiB f32 working block: safe on v5e/v6e/v7x


def _residual_dwconv_kernel(x_ref, wb_ref, m_ref, o_ref, *, W):
    # x_ref:  (BR, L)  input rows; one row = one (n, c) channel plane, flat H*W
    #                  (lane-padded to L = round_up(H*W, 128))
    # wb_ref: (BR, 10) cols 0..8: BN-folded 3x3 taps (row-major dh*3+dw),
    #                  col 9: BN-folded bias
    # m_ref:  (4, L)   {0,1} validity masks: [left, right, up, down]
    # o_ref:  (BR, L)  output rows
    x = x_ref[...].astype(jnp.float32)          # f32 math (v5e VPU has no bf16)
    L = x.shape[-1]

    m_l = m_ref[0:1, :]                         # source column j-1 valid
    m_r = m_ref[1:2, :]                         # source column j+1 valid
    m_u = m_ref[2:3, :]                         # source row    i-1 valid
    m_d = m_ref[3:4, :]                         # source row    i+1 valid

    # Column-shifted copies: 2 XLU rolls; wrap-around killed by column masks.
    x_l = pltpu.roll(x, shift=1, axis=1) * m_l          # x[i, j-1]
    x_r = pltpu.roll(x, shift=L - 1, axis=1) * m_r      # x[i, j+1]

    def hrow(dh):
        # Horizontal weighted sum of kernel row dh, evaluated at the source row.
        w0 = wb_ref[:, 3 * dh + 0:3 * dh + 1]
        w1 = wb_ref[:, 3 * dh + 1:3 * dh + 2]
        w2 = wb_ref[:, 3 * dh + 2:3 * dh + 3]
        return x_l * w0 + x * w1 + x_r * w2

    # Residual + folded BN bias + centre kernel row (no vertical shift).
    acc = x + wb_ref[:, 9:10] + hrow(1)
    # Kernel row dh=0 comes from image row i-1: roll down by +W, mask i>=1.
    acc = acc + pltpu.roll(hrow(0), shift=W, axis=1) * m_u
    # Kernel row dh=2 comes from image row i+1: roll up by W, mask i<=H-2.
    acc = acc + pltpu.roll(hrow(2), shift=L - W, axis=1) * m_d

    o_ref[...] = acc.astype(o_ref.dtype)


def _pick_block_rows(ncp, hwp):
    """Row-block size: divides ncp (a multiple of 8), <= 1 MiB f32 working set,
    and leaves >= ~8 grid steps when ncp allows (megacore / pipelining)."""
    bytes_per_row = hwp * 4
    max_rows_by_bytes = max(8, (_MAX_BLOCK_F32_BYTES // bytes_per_row) // 8 * 8)
    max_rows_by_steps = max(8, ncp // 8)        # aim for >= ~8 grid steps
    cap = min(max_rows_by_bytes, max_rows_by_steps, ncp)
    br = 8
    for cand in range(cap - cap % 8, 7, -8):    # largest mult-of-8 divisor <= cap
        if ncp % cand == 0:
            br = cand
            break
    return br


@jax.jit
def residual_dwconv_bn(x_nchw, conv_w, bn_gamma, bn_beta, bn_mean, bn_var,
                       eps=1e-5):
    """out = x + BN(depthwise_conv3x3(x, pad=1)); x NCHW, conv_w (C,1,3,3)."""
    N, C, H, W = x_nchw.shape
    NC, HW = N * C, H * W

    # ---- parameter folding (tiny, plain JAX; not the hot path) ----
    scale = bn_gamma / jnp.sqrt(bn_var + eps)                        # (C,)
    bias = bn_beta - bn_mean * scale                                 # (C,)
    w9 = (conv_w[:, 0, :, :] * scale[:, None, None]).reshape(C, 9)   # (C,9)
    wb = jnp.concatenate([w9, bias[:, None]], axis=1)                # (C,10)
    wb_rows = jnp.tile(wb, (N, 1)).astype(jnp.float32)               # (NC,10)

    # ---- lane-dense slab; pad lanes to x128 and rows to x8 ----
    HWP = ((HW + 127) // 128) * 128
    NCP = ((NC + 7) // 8) * 8
    x2 = x_nchw.reshape(NC, HW)                  # free reshape (contiguous)
    if HWP != HW or NCP != NC:
        x2 = jnp.pad(x2, ((0, NCP - NC), (0, HWP - HW)))
        wb_rows = jnp.pad(wb_rows, ((0, NCP - NC), (0, 0)))

    # ---- 4 boundary masks over the padded flat index (4*HWP*4 bytes) ----
    p = jnp.arange(HWP, dtype=jnp.int32)
    jj = p % W
    ii = p // W
    masks = jnp.stack([
        (jj >= 1),          # left  neighbour valid
        (jj <= W - 2),      # right neighbour valid
        (ii >= 1),          # row above valid
        (ii <= H - 2),      # row below valid
    ], axis=0).astype(jnp.float32)                                   # (4,HWP)

    # ---- hot path: single-pass Pallas kernel on the (NCP, HWP) slab ----
    BR = _pick_block_rows(NCP, HWP)
    grid = (NCP // BR,)
    kernel = functools.partial(_residual_dwconv_kernel, W=W)

    out2 = pl.pallas_call(
        kernel,
        out_shape=jax.ShapeDtypeStruct((NCP, HWP), x_nchw.dtype),
        grid_spec=pltpu.PrefetchScalarGridSpec(
            num_scalar_prefetch=0,
            grid=grid,
            in_specs=[
                pl.BlockSpec((BR, HWP), lambda i: (i, 0)),   # x rows
                pl.BlockSpec((BR, 10), lambda i: (i, 0)),    # taps + bias
                pl.BlockSpec((4, HWP), lambda i: (0, 0)),    # masks (tiny)
            ],
            out_specs=pl.BlockSpec((BR, HWP), lambda i: (i, 0)),
        ),
        compiler_params=pltpu.CompilerParams(
            dimension_semantics=("parallel",),
            vmem_limit_bytes=32 << 20),
    )(x2, wb_rows, masks)

    if HWP != HW or NCP != NC:
        out2 = out2[:NC, :HW]
    return out2.reshape(N, C, H, W)              # free reshape back to NCHW


def _reference(x_nchw, conv_w, bn_gamma, bn_beta, bn_mean, bn_var, eps=1e-5):
    """Pure-JAX reference (depthwise conv + eval BN + residual), NCHW."""
    C = x_nchw.shape[1]
    y = lax.conv_general_dilated(
        x_nchw.astype(jnp.float32), conv_w.astype(jnp.float32),
        window_strides=(1, 1), padding=((1, 1), (1, 1)),
        dimension_numbers=("NCHW", "OIHW", "NCHW"),
        feature_group_count=C)
    scale = bn_gamma / jnp.sqrt(bn_var + eps)
    bias = bn_beta - bn_mean * scale
    y = y * scale[None, :, None, None] + bias[None, :, None, None]
    return x_nchw.astype(jnp.float32) + y


if __name__ == "__main__":
    key = jax.random.PRNGKey(0)
    k_x, k_w, k_m, k_v = jax.random.split(key, 4)

    N, C, H, W = 2, 4, 16, 16
    x = jax.random.normal(k_x, (N, C, H, W), dtype=jnp.float32)

    # Conv2d_BN(C, C, ks=3, stride=1, pad=1, groups=C) parameters
    conv_w = jax.random.normal(k_w, (C, 1, 3, 3), dtype=jnp.float32) * 0.1
    bn_gamma = jnp.ones((C,), jnp.float32)          # bn_weight_init=1
    bn_beta = jnp.zeros((C,), jnp.float32)          # init 0
    bn_mean = jax.random.normal(k_m, (C,), jnp.float32) * 0.05
    bn_var = jax.random.uniform(k_v, (C,), jnp.float32, 0.5, 1.5)

    out = residual_dwconv_bn(x, conv_w, bn_gamma, bn_beta, bn_mean, bn_var)
    out = jax.block_until_ready(out)

    ref = _reference(x, conv_w, bn_gamma, bn_beta, bn_mean, bn_var)
    assert out.shape == (N, C, H, W)
    assert jnp.allclose(out, ref, atol=1e-4, rtol=1e-4), "mismatch vs reference"

    print("KERNEL_OK")
</pallas_src>

<mosaic_0001>
module attributes {stable_mosaic.version = 11 : i64} {
  func.func @_residual_dwconv_kernel(%arg0: i32, %arg1: memref<8x256xf32, #tpu.memory_space<vmem>>, %arg2: memref<8x10xf32, #tpu.memory_space<vmem>>, %arg3: memref<4x256xf32, #tpu.memory_space<vmem>>, %arg4: memref<8x256xf32, #tpu.memory_space<vmem>>) attributes {dimension_semantics = [#tpu.dimension_semantics<parallel>], iteration_bounds = array<i64: 1>, scalar_prefetch = 0 : i64, scratch_operands = 0 : i64, tpu.core_type = #tpu.core_type<tc>, window_params = [{transform_indices = @transform_0, window_bounds = array<i64: 8, 256>}, {transform_indices = @transform_1, window_bounds = array<i64: 8, 10>}, {pipeline_mode = #tpu.pipeline_mode<synchronous>, transform_indices = @transform_2, window_bounds = array<i64: 4, 256>}, {transform_indices = @transform_3, window_bounds = array<i64: 8, 256>}]} {
    %c0 = arith.constant 0 : index
    %c0_0 = arith.constant 0 : index
    %0 = vector.load %arg1[%c0, %c0_0] : memref<8x256xf32, #tpu.memory_space<vmem>>, vector<8x256xf32>
    %c0_1 = arith.constant 0 : index
    %c0_2 = arith.constant 0 : index
    %1 = vector.load %arg3[%c0_1, %c0_2] : memref<4x256xf32, #tpu.memory_space<vmem>>, vector<1x256xf32>
    %c1 = arith.constant 1 : index
    %c0_3 = arith.constant 0 : index
    %2 = vector.load %arg3[%c1, %c0_3] : memref<4x256xf32, #tpu.memory_space<vmem>>, vector<1x256xf32>
    %c2 = arith.constant 2 : index
    %c0_4 = arith.constant 0 : index
    %3 = vector.load %arg3[%c2, %c0_4] : memref<4x256xf32, #tpu.memory_space<vmem>>, vector<1x256xf32>
    %c3 = arith.constant 3 : index
    %c0_5 = arith.constant 0 : index
    %4 = vector.load %arg3[%c3, %c0_5] : memref<4x256xf32, #tpu.memory_space<vmem>>, vector<1x256xf32>
    %c1_i32 = arith.constant 1 : i32
    %5 = tpu.dynamic_rotate %0 by %c1_i32 dim 1 : vector<8x256xf32>, i32 -> vector<8x256xf32>
    %6 = vector.broadcast %1 : vector<1x256xf32> to vector<8x256xf32>
    %7 = arith.mulf %5, %6 : vector<8x256xf32>
    %c255_i32 = arith.constant 255 : i32
    %8 = tpu.dynamic_rotate %0 by %c255_i32 dim 1 : vector<8x256xf32>, i32 -> vector<8x256xf32>
    %9 = vector.broadcast %2 : vector<1x256xf32> to vector<8x256xf32>
    %10 = arith.mulf %8, %9 : vector<8x256xf32>
    %c0_6 = arith.constant 0 : index
    %c9 = arith.constant 9 : index
    %11 = vector.load %arg2[%c0_6, %c9] : memref<8x10xf32, #tpu.memory_space<vmem>>, vector<8x1xf32>
    %12 = vector.broadcast %11 : vector<8x1xf32> to vector<8x256xf32>
    %13 = arith.addf %0, %12 : vector<8x256xf32>
    %c0_7 = arith.constant 0 : index
    %c3_8 = arith.constant 3 : index
    %14 = vector.load %arg2[%c0_7, %c3_8] : memref<8x10xf32, #tpu.memory_space<vmem>>, vector<8x1xf32>
    %c0_9 = arith.constant 0 : index
    %c4 = arith.constant 4 : index
    %15 = vector.load %arg2[%c0_9, %c4] : memref<8x10xf32, #tpu.memory_space<vmem>>, vector<8x1xf32>
    %c0_10 = arith.constant 0 : index
    %c5 = arith.constant 5 : index
    %16 = vector.load %arg2[%c0_10, %c5] : memref<8x10xf32, #tpu.memory_space<vmem>>, vector<8x1xf32>
    %17 = vector.broadcast %14 : vector<8x1xf32> to vector<8x256xf32>
    %18 = arith.mulf %7, %17 : vector<8x256xf32>
    %19 = vector.broadcast %15 : vector<8x1xf32> to vector<8x256xf32>
    %20 = arith.mulf %0, %19 : vector<8x256xf32>
    %21 = arith.addf %18, %20 : vector<8x256xf32>
    %22 = vector.broadcast %16 : vector<8x1xf32> to vector<8x256xf32>
    %23 = arith.mulf %10, %22 : vector<8x256xf32>
    %24 = arith.addf %21, %23 : vector<8x256xf32>
    %25 = arith.addf %13, %24 : vector<8x256xf32>
    %c0_11 = arith.constant 0 : index
    %c0_12 = arith.constant 0 : index
    %26 = vector.load %arg2[%c0_11, %c0_12] : memref<8x10xf32, #tpu.memory_space<vmem>>, vector<8x1xf32>
    %c0_13 = arith.constant 0 : index
    %c1_14 = arith.constant 1 : index
    %27 = vector.load %arg2[%c0_13, %c1_14] : memref<8x10xf32, #tpu.memory_space<vmem>>, vector<8x1xf32>
    %c0_15 = arith.constant 0 : index
    %c2_16 = arith.constant 2 : index
    %28 = vector.load %arg2[%c0_15, %c2_16] : memref<8x10xf32, #tpu.memory_space<vmem>>, vector<8x1xf32>
    %29 = vector.broadcast %26 : vector<8x1xf32> to vector<8x256xf32>
    %30 = arith.mulf %7, %29 : vector<8x256xf32>
    %31 = vector.broadcast %27 : vector<8x1xf32> to vector<8x256xf32>
    %32 = arith.mulf %0, %31 : vector<8x256xf32>
    %33 = arith.addf %30, %32 : vector<8x256xf32>
    %34 = vector.broadcast %28 : vector<8x1xf32> to vector<8x256xf32>
    %35 = arith.mulf %10, %34 : vector<8x256xf32>
    %36 = arith.addf %33, %35 : vector<8x256xf32>
    %c16_i32 = arith.constant 16 : i32
    %37 = tpu.dynamic_rotate %36 by %c16_i32 dim 1 : vector<8x256xf32>, i32 -> vector<8x256xf32>
    %38 = vector.broadcast %3 : vector<1x256xf32> to vector<8x256xf32>
    %39 = arith.mulf %37, %38 : vector<8x256xf32>
    %40 = arith.addf %25, %39 : vector<8x256xf32>
    %c0_17 = arith.constant 0 : index
    %c6 = arith.constant 6 : index
    %41 = vector.load %arg2[%c0_17, %c6] : memref<8x10xf32, #tpu.memory_space<vmem>>, vector<8x1xf32>
    %c0_18 = arith.constant 0 : index
    %c7 = arith.constant 7 : index
    %42 = vector.load %arg2[%c0_18, %c7] : memref<8x10xf32, #tpu.memory_space<vmem>>, vector<8x1xf32>
    %c0_19 = arith.constant 0 : index
    %c8 = arith.constant 8 : index
    %43 = vector.load %arg2[%c0_19, %c8] : memref<8x10xf32, #tpu.memory_space<vmem>>, vector<8x1xf32>
    %44 = vector.broadcast %41 : vector<8x1xf32> to vector<8x256xf32>
    %45 = arith.mulf %7, %44 : vector<8x256xf32>
    %46 = vector.broadcast %42 : vector<8x1xf32> to vector<8x256xf32>
    %47 = arith.mulf %0, %46 : vector<8x256xf32>
    %48 = arith.addf %45, %47 : vector<8x256xf32>
    %49 = vector.broadcast %43 : vector<8x1xf32> to vector<8x256xf32>
    %50 = arith.mulf %10, %49 : vector<8x256xf32>
    %51 = arith.addf %48, %50 : vector<8x256xf32>
    %c240_i32 = arith.constant 240 : i32
    %52 = tpu.dynamic_rotate %51 by %c240_i32 dim 1 : vector<8x256xf32>, i32 -> vector<8x256xf32>
    %53 = vector.broadcast %4 : vector<1x256xf32> to vector<8x256xf32>
    %54 = arith.mulf %52, %53 : vector<8x256xf32>
    %55 = arith.addf %40, %54 : vector<8x256xf32>
    %c0_20 = arith.constant 0 : index
    %c0_21 = arith.constant 0 : index
    %56 = vector.load %arg4[%c0_20, %c0_21] : memref<8x256xf32, #tpu.memory_space<vmem>>, vector<8x256xf32>
    tpu.vector_store %arg4[%c0_20, %c0_21], %55 {strides = array<i32>} : memref<8x256xf32, #tpu.memory_space<vmem>>, vector<8x256xf32>,
    return
  }
  func.func @transform_0(%arg0: i32) -> (i32, i32) {
    %c0_i32 = arith.constant 0 : i32
    %c0_i32_0 = arith.constant 0 : i32
    return %arg0, %c0_i32 : i32, i32
  }
  func.func @transform_1(%arg0: i32) -> (i32, i32) {
    %c0_i32 = arith.constant 0 : i32
    %c0_i32_0 = arith.constant 0 : i32
    return %arg0, %c0_i32 : i32, i32
  }
  func.func @transform_2(%arg0: i32) -> (i32, i32) {
    %c0_i32 = arith.constant 0 : i32
    %c0_i32_0 = arith.constant 0 : i32
    %c0_i32_1 = arith.constant 0 : i32
    return %c0_i32, %c0_i32_0 : i32, i32
  }
  func.func @transform_3(%arg0: i32) -> (i32, i32) {
    %c0_i32 = arith.constant 0 : i32
    %c0_i32_0 = arith.constant 0 : i32
    return %arg0, %c0_i32 : i32, i32
  }
}

</mosaic_0001>

<bundles_post_ra>
// kernel: residual_dwconv_bn.1
= control target key start
LH: loop header
LB: loop body
LE: loop exit
PB: predicated region body
PF: predicated region fallthrough
CT: control target
= control target key end

     0   :  { %v219_v0 = vmov 2   ;;  %v220_v1 = vmov 0   ;;  %v221_v3 = vmov 6   ;;  %v222_v4 = vmov 1   ;;  %s224_s16 = smov 1   ;;  %s228_s18 = smov 127   ;;  %s314_s1 = inlined_call_operand.vmem [shape: f32[8,10], index: 1, kind: input, shape index: {}]   ;;  %s315_s0 = inlined_call_operand.vmem [shape: f32[8,256], index: 0, kind: input, shape index: {}]   ;;  %s316_s2 = inlined_call_operand.vmem [shape: f32[4,256], index: 2, kind: input, shape index: {}]   ;;  %s317_s3 = inlined_call_operand.vmem [shape: f32[8,256], index: 3, kind: output, shape index: {}]  }
   0x1   :  { %210 = vset.pattern.permute.xlu1 %v219_v0  ;;  %208 = vset.pattern.permute.xlu0 %v220_v1  ;;  %v65_v2 = vld [vmem:[%s314_s1] sm:$0xff]  ;;  %v223_v6 = vmov 7   ;;  %v225_v7 = vmov 8   ;;  %v265_v8 = vld [vmem:[%s315_s0 + $0x8] sm:$0xff]  ;;  %v226_v9 = vmov 4   ;;  %v227_v10 = vmov 3  }
   0x2   :  { %112 = vperm.xlu1 %210, %v65_v2   ;;  %98 = vperm.xlu0 %208, %v65_v2   ;;  %v259_v5 = vld [vmem:[%s315_s0] sm:$0xff]  ;;  %v229_v11 = vmov 9   ;;  %v230_v12 = vmov 5   ;;  %v27_v15 = vlaneseq  ;;  %s231_s22 = smov 112   ;;  %s232_s23 = smov 16  }
   0x3   :  { %v16_v22 = vld [vmem:[%s316_s2] ss:$4 sm:$0x3]  ;;  %v191_v29 = vld [vmem:[%s316_s2 + $0x1] ss:$4 sm:$0x3] }
   0x4   :  { %v34_v17 = vshrl.u32 %v27_v15, 7  ;;  %v270_v19 = vand.u32 127, %v27_v15 }
   0x6   :  { %211 = vset.pattern.permute.xlu1 %v221_v3  ;;  %209 = vset.pattern.permute.xlu0 %v222_v4  ;;  %v272_v21 = vsub.s32 0, %v34_v17  ;;  %vm29_vm0 = vcmp.lt.s32.totalorder %v270_v19, 1  ;;  %v278_v23 = vsub.s32 1, %v34_v17  ;;  %vm49_vm1 = vcmp.lt.s32.totalorder %v270_v19, 127 }
   0x7   :  { %142 = vperm.xlu1 %211, %v65_v2   ;;  %104 = vperm.xlu0 %209, %v65_v2   ;;  %vm123_vm2 = vcmp.lt.s32.totalorder %v270_v19, 16  ;;  %vm167_vm3 = vcmp.lt.s32.totalorder %v270_v19, 112 }
   0x8   :  { %v36_v25 = vrot.slane %v16_v22, %v272_v21  ;;  %v40_v28 = vrot.slane %v16_v22, %v278_v23  ;;  %v56_v33 = vrot.slane %v191_v29, %v272_v21  ;;  %v60_v34 = vrot.slane %v191_v29, %v278_v23 }
   0xb   :  { %212 = vset.pattern.permute.xlu1 %v223_v6  ;;  %23 = vrot.lane.b32.xlu0 %v259_v5, %s224_s16 }
   0xc   :  { %148 = vperm.xlu1 %212, %v65_v2   ;;  %213 = vset.pattern.permute.xlu0 %v225_v7 }
   0xf   :  { %156 = vperm.xlu0 %213, %v65_v2  }
  0x10   :  { %25 = vrot.lane.b32.xlu1 %v265_v8, %s224_s16 }
  0x11   :  { %215 = vset.pattern.permute.xlu1 %v226_v9 }
  0x13   :  { %214 = vset.pattern.permute.xlu0 %v227_v10 }
  0x14   :  { %45 = vrot.lane.b32.xlu1 %v259_v5, %s228_s18  ;;  %74 = vperm.xlu0 %214, %v65_v2  }
  0x18   :  { %47 = vrot.lane.b32.xlu1 %v265_v8, %s228_s18  ;;  %217 = vset.pattern.permute.xlu0 %v229_v11 }
  0x19   :  { %68 = vperm.xlu0 %217, %v65_v2  }
  0x1c   :  { %80 = vperm.xlu1 %215, %v65_v2  }
  0x1d   :  { %218 = vset.pattern.permute.xlu0 %v225_v7 }
  0x20   :  { %216 = vset.pattern.permute.xlu1 %v230_v12 }
  0x21   :  { %88 = vperm.xlu1 %216, %v65_v2  }
  0x81   :  { %v113_v13 = vpop.permute.xlu1 %112  ;;  %v99_v14 = vpop.permute.xlu0 %98 }
  0x86   :  { %v143_v16 = vpop.permute.xlu1 %142  ;;  %v105_v18 = vpop.permute.xlu0 %104 }
  0x87   :  { %v107_v37 = vmul.f32 %v105_v18, %v259_v5  ;;  %v108_v46 = vmul.f32 %v105_v18, %v265_v8  ;;  %v193_v18 = vld [vmem:[%s316_s2 + $0x3] ss:$4 sm:$0x3] }
  0x88   :  { %v174_v29 = vrot.slane %v193_v18, %v272_v21 }
  0x8a   :  { %v24_v24 = vpop.permute.xlu0 %23 }
  0x8b   :  { %v149_v20 = vpop.permute.xlu1 %148 }
  0x8c   :  { %v151_v43 = vmul.f32 %v149_v20, %v259_v5  ;;  %v152_v63 = vmul.f32 %v149_v20, %v265_v8 }
  0x8e   :  { %v157_v36 = vpop.permute.xlu0 %156 }
  0x8f   :  { %v26_v26 = vpop.permute.xlu1 %25 }
  0x90   :  { %v31_v27 = vsel %vm29_vm0, %v26_v26, %v24_v24  ;;  %v30_v30 = vsel %vm29_vm0, %v24_v24, %v26_v26 }
  0x91   :  { %v43_v31 = vmul.f32 %v36_v25, %v31_v27  ;;  %v44_v35 = vmul.f32 %v40_v28, %v30_v30  ;;  %v178_v30 = vrot.slane %v193_v18, %v278_v23 }
  0x93   :  { %v46_v32 = vpop.permute.xlu1 %45  ;;  %v101_v38 = vmul.f32 %v99_v14, %v43_v31  ;;  %v145_v39 = vmul.f32 %v143_v16, %v43_v31  ;;  %v102_v47 = vmul.f32 %v99_v14, %v44_v35  ;;  %v75_v53 = vpop.permute.xlu0 %74  ;;  %v146_v60 = vmul.f32 %v143_v16, %v44_v35 }
  0x94   :  { %v77_v61 = vmul.f32 %v75_v53, %v43_v31  ;;  %v78_v62 = vmul.f32 %v75_v53, %v44_v35 }
  0x95   :  { %v153_v49 = vadd.f32 %v151_v43, %v145_v39  ;;  %v109_v51 = vadd.f32 %v107_v37, %v101_v38  ;;  %v110_v59 = vadd.f32 %v108_v46, %v102_v47  ;;  %v154_v11 = vadd.f32 %v152_v63, %v146_v60 }
  0x97   :  { %v48_v40 = vpop.permute.xlu1 %47 }
  0x98   :  { %v50_v41 = vsel %vm49_vm1, %v46_v32, %v48_v40  ;;  %v51_v42 = vsel %vm49_vm1, %v48_v40, %v46_v32  ;;  %v69_v15 = vpop.permute.xlu0 %68 }
  0x99   :  { %v63_v44 = vmul.f32 %v56_v33, %v50_v41  ;;  %v64_v45 = vmul.f32 %v60_v34, %v51_v42  ;;  %v71_v20 = vadd.f32 %v69_v15, %v259_v5  ;;  %v72_v22 = vadd.f32 %v69_v15, %v265_v8 }
  0x9b   :  { %v81_v48 = vpop.permute.xlu1 %80  ;;  %v159_v50 = vmul.f32 %v157_v36, %v63_v44  ;;  %v115_v52 = vmul.f32 %v113_v13, %v63_v44  ;;  %v116_v54 = vmul.f32 %v113_v13, %v64_v45  ;;  %v160_v2 = vmul.f32 %v157_v36, %v64_v45  ;;  %v192_v13 = vld [vmem:[%s316_s2 + $0x2] ss:$4 sm:$0x3] }
  0x9c   :  { %v83_v55 = vmul.f32 %v81_v48, %v259_v5  ;;  %v84_v56 = vmul.f32 %v81_v48, %v265_v8  ;;  %v130_v16 = vrot.slane %v192_v13, %v272_v21  ;;  %v134_v17 = vrot.slane %v192_v13, %v278_v23 }
  0x9d   :  { %v161_v57 = vadd.f32 %v159_v50, %v153_v49  ;;  %v117_v58 = vadd.f32 %v115_v52, %v109_v51  ;;  %v118_v1 = vadd.f32 %v116_v54, %v110_v59  ;;  %v162_v12 = vadd.f32 %v160_v2, %v154_v11 }
  0x9e   :  { %v85_v3 = vadd.f32 %v83_v55, %v77_v61  ;;  %v86_v4 = vadd.f32 %v84_v56, %v78_v62 }
  0x9f   :  { %163 = vrot.lane.b32.xlu0 %v161_v57, %s231_s22  ;;  %119 = vrot.lane.b32.xlu1 %v117_v58, %s232_s23 }
  0xa0   :  { %v89_v0 = vpop.permute.xlu1 %88 }
  0xa1   :  { %v91_v6 = vmul.f32 %v89_v0, %v63_v44  ;;  %v92_v7 = vmul.f32 %v89_v0, %v64_v45 }
  0xa3   :  { %v93_v9 = vadd.f32 %v91_v6, %v85_v3  ;;  %v94_v10 = vadd.f32 %v92_v7, %v86_v4  ;;  %121 = vrot.lane.b32.xlu1 %v118_v1, %s232_s23 }
  0xa5   :  { %v95_v31 = vadd.f32 %v93_v9, %v71_v20  ;;  %v96_v32 = vadd.f32 %v94_v10, %v72_v22 }
  0xa7   :  { %165 = vrot.lane.b32.xlu1 %v162_v12, %s231_s22 }
 0x111   :  { %v120_v14 = vpop.permute.xlu1 %119  ;;  %v164_v33 = vpop.permute.xlu0 %163 }
 0x115   :  { %v122_v24 = vpop.permute.xlu1 %121 }
 0x116   :  { %v124_v25 = vsel %vm123_vm2, %v120_v14, %v122_v24  ;;  %v125_v26 = vsel %vm123_vm2, %v122_v24, %v120_v14 }
 0x117   :  { %v137_v27 = vmul.f32 %v130_v16, %v125_v26  ;;  %v138_v28 = vmul.f32 %v134_v17, %v124_v25 }
 0x119   :  { %v166_v34 = vpop.permute.xlu1 %165  ;;  %v139_v5 = vadd.f32 %v137_v27, %v95_v31  ;;  %v140_v37 = vadd.f32 %v138_v28, %v96_v32 }
 0x11a   :  { %v168_v35 = vsel %vm167_vm3, %v164_v33, %v166_v34  ;;  %v169_v36 = vsel %vm167_vm3, %v166_v34, %v164_v33 }
 0x11b   :  { %v181_v8 = vmul.f32 %v174_v29, %v168_v35  ;;  %v182_v38 = vmul.f32 %v178_v30, %v169_v36 }
 0x11d   :  { %v183_v39 = vadd.f32 %v181_v8, %v139_v5  ;;  %v184_v40 = vadd.f32 %v182_v38, %v140_v37 }
 0x11f   :  { %185 = vst [vmem:[%s317_s3] sm:$0xff] %v183_v39  ;;  %186 = vst [vmem:[%s317_s3 + $0x8] sm:$0xff] %v184_v40 }

</bundles_post_ra>
